<compile_context>
chip_gen: v5e
topology: v5e:2x2
jax: 0.10.0
libtpu: 0.0.40
codegen_flags: <defaults>
</compile_context>

<pallas_src>
import functools

import jax
import jax.numpy as jnp
from jax.experimental import pallas as pl
from jax.experimental.pallas import tpu as pltpu


def _round_up(a, m):
    return ((a + m - 1) // m) * m


def _choose_tile(padded_lanes, tile_cap=1024, min_steps=2):
    """Pick a lane tile (multiple of 128) that divides padded_lanes.

    Caps the tile at tile_cap and, when the batch is big enough, guarantees at
    least `min_steps` grid steps so the "parallel" batch axis can be sharded
    across both TensorCores on v7x (no-op on v5e/v6e).
    """
    k = padded_lanes // 128
    n_min = max(-(-padded_lanes // tile_cap), min(min_steps, k))
    for n in range(n_min, k + 1):
        if k % n == 0:
            return padded_lanes // n
    return 128


def _softplus_f32(x):
    # Matches torch.nn.Softplus(beta=1, threshold=20):
    #   y = x                if x > 20
    #   y = log(1 + exp(x))  otherwise
    safe = jnp.minimum(x, 20.0)
    return jnp.where(x > 20.0, x, jnp.log1p(jnp.exp(safe)))


def safeset_kernel(x_ref,
                   w1_ref, b1_ref,
                   w2_ref, b2_ref,
                   w3_ref, b3_ref,
                   w4_ref, b4_ref,
                   o_ref):
    # x tile: (n_states, tile) with the batch on the lane axis.
    x = x_ref[...]
    if x.dtype != jnp.bfloat16:           # callers should pass bf16; cast only if not
        x = x.astype(jnp.bfloat16)

    # h = W @ x  (bf16 MXU operands, f32 accumulation); activations in f32.
    h = jnp.dot(w1_ref[...], x, preferred_element_type=jnp.float32) + b1_ref[...]
    h = _softplus_f32(h)

    h = jnp.dot(w2_ref[...], h.astype(jnp.bfloat16),
                preferred_element_type=jnp.float32) + b2_ref[...]
    h = _softplus_f32(h)

    h = jnp.dot(w3_ref[...], h.astype(jnp.bfloat16),
                preferred_element_type=jnp.float32) + b3_ref[...]
    h = _softplus_f32(h)

    # Final layer: (1, n_neurons) @ (n_neurons, tile) on the (otherwise idle)
    # MXU -> lane-dense (1, tile) row.
    z = jnp.dot(w4_ref[...], h.astype(jnp.bfloat16),
                preferred_element_type=jnp.float32) + b4_ref[...]

    # Exact sigmoid (EUP exp + VPU divide).
    o_ref[...] = (1.0 / (1.0 + jnp.exp(-z))).astype(o_ref.dtype)


def _safeset_forward(x_t, kp, *, tile_lanes=1024):
    """x_t: (n_states, B), preferably bf16.  kp: prepare_params() output.

    Returns the safety value as (B, 1) f32, matching the PyTorch module.
    """
    n_states, B = x_t.shape
    n_neurons = kp["w1"].shape[0]

    # Pad the batch only to the 128-lane granule (not to a full tile).
    padded_B = _round_up(max(B, 1), 128)
    xp = x_t if padded_B == B else jnp.pad(x_t, ((0, 0), (0, padded_B - B)))
    tile = _choose_tile(padded_B, tile_cap=tile_lanes)
    n_tiles = padded_B // tile

    param_bytes = sum(int(a.size) * a.dtype.itemsize for a in kp.values())
    flops = 2 * padded_B * (n_states * n_neurons + 2 * n_neurons * n_neurons + n_neurons)
    transcendentals = padded_B * (6 * n_neurons + 1)   # exp+log per softplus, exp for sigmoid
    bytes_accessed = (int(xp.size) * xp.dtype.itemsize   # x stream
                      + padded_B * 4                      # output row
                      + param_bytes)

    const = lambda i: (0, 0)  # weights/biases: same block every grid step (VMEM-resident)
    out = pl.pallas_call(
        safeset_kernel,
        out_shape=jax.ShapeDtypeStruct((1, padded_B), jnp.float32),
        grid=(n_tiles,),
        in_specs=[
            pl.BlockSpec((n_states, tile), lambda i: (0, i)),      # x: batch on lanes
            pl.BlockSpec((n_neurons, n_states), const),            # w1 (out, in)
            pl.BlockSpec((n_neurons, 1), const),                   # b1 (out, 1)
            pl.BlockSpec((n_neurons, n_neurons), const),           # w2
            pl.BlockSpec((n_neurons, 1), const),                   # b2
            pl.BlockSpec((n_neurons, n_neurons), const),           # w3
            pl.BlockSpec((n_neurons, 1), const),                   # b3
            pl.BlockSpec((1, n_neurons), const),                   # w4
            pl.BlockSpec((1, 1), const),                           # b4
        ],
        out_specs=pl.BlockSpec((1, tile), lambda i: (0, i)),        # lane-dense output
        compiler_params=pltpu.CompilerParams(
            dimension_semantics=("parallel",)),
        cost_estimate=pl.CostEstimate(
            flops=int(flops),
            transcendentals=int(transcendentals),
            bytes_accessed=int(bytes_accessed)),
    )(xp, kp["w1"], kp["b1"], kp["w2"], kp["b2"],
      kp["w3"], kp["b3"], kp["w4"], kp["b4"])

    return out[0, :B].reshape(B, 1)


safeset_forward = jax.jit(_safeset_forward, static_argnames=("tile_lanes",))


def init_params(key, n_states, n_neurons):
    """Init mimicking torch.nn.Linear's U(-1/sqrt(fan_in), 1/sqrt(fan_in)).

    Weights are in PyTorch layout (out, in); biases are (out, 1).
    """
    def linear(k, fan_in, fan_out):
        kw, kb = jax.random.split(k)
        bound = 1.0 / jnp.sqrt(jnp.float32(fan_in))
        w = jax.random.uniform(kw, (fan_out, fan_in), jnp.float32, -bound, bound)
        b = jax.random.uniform(kb, (fan_out, 1), jnp.float32, -bound, bound)
        return w, b

    k1, k2, k3, k4 = jax.random.split(key, 4)
    w1, b1 = linear(k1, n_states, n_neurons)
    w2, b2 = linear(k2, n_neurons, n_neurons)
    w3, b3 = linear(k3, n_neurons, n_neurons)
    w4, b4 = linear(k4, n_neurons, 1)
    return dict(w1=w1, b1=b1, w2=w2, b2=b2, w3=w3, b3=b3, w4=w4, b4=b4)


def prepare_params(p):
    """One-time cast of the parameters to their kernel dtypes (bf16 weights on
    the MXU, f32 biases on the VPU).  Do this once, outside the hot loop."""
    return dict(
        w1=p["w1"].astype(jnp.bfloat16), b1=p["b1"].astype(jnp.float32),
        w2=p["w2"].astype(jnp.bfloat16), b2=p["b2"].astype(jnp.float32),
        w3=p["w3"].astype(jnp.bfloat16), b3=p["b3"].astype(jnp.float32),
        w4=p["w4"].astype(jnp.bfloat16), b4=p["b4"].astype(jnp.float32),
    )


def reference_forward_f32(x_t, p):
    """Pure-JAX f32 reference of the PyTorch module's forward (transposed layout)."""
    h = _softplus_f32(p["w1"] @ x_t + p["b1"])
    h = _softplus_f32(p["w2"] @ h + p["b2"])
    h = _softplus_f32(p["w3"] @ h + p["b3"])
    z = p["w4"] @ h + p["b4"]
    return jax.nn.sigmoid(z).reshape(-1, 1)


def reference_forward_bf16(x_t, p):
    """Reference matching the kernel's bf16-MXU / f32-activation numerics."""
    def mm(w, a):
        return jnp.dot(w.astype(jnp.bfloat16), a.astype(jnp.bfloat16),
                       preferred_element_type=jnp.float32)
    h = _softplus_f32(mm(p["w1"], x_t) + p["b1"])
    h = _softplus_f32(mm(p["w2"], h) + p["b2"])
    h = _softplus_f32(mm(p["w3"], h) + p["b3"])
    z = mm(p["w4"], h) + p["b4"]
    return jax.nn.sigmoid(z).reshape(-1, 1)


if __name__ == "__main__":
    # TODO(synk): only the 'Softplus' activation branch of SafeSet is implemented.
    key = jax.random.PRNGKey(0)
    k_x, k_p, k_x2 = jax.random.split(key, 3)

    # Small shapes consistent with the module: n_states=4, n_neurons=32, batch=8.
    B, n_states, n_neurons = 8, 4, 32
    # Input stored batch-on-lanes (n_states, B) and in bf16 (halves the
    # dominant HBM stream; no extra wrapper-side cast).
    x_t = jax.random.normal(k_x, (n_states, B), jnp.float32).astype(jnp.bfloat16)
    raw = init_params(k_p, n_states, n_neurons)
    kp = prepare_params(raw)

    out = jax.block_until_ready(safeset_forward(x_t, kp))
    assert out.shape == (B, 1)
    assert jnp.allclose(out, reference_forward_bf16(x_t, raw),
                        atol=5e-3, rtol=5e-3), "mismatch vs bf16-matched reference"
    assert jnp.allclose(out, reference_forward_f32(x_t.astype(jnp.float32), raw),
                        atol=2e-2, rtol=2e-2), "mismatch vs f32 reference"

    # Exercise the lane-granule padding + multi-step grid path (B=600 -> 640
    # padded lanes, several "parallel" grid steps).
    B2 = 600
    x2_t = jax.random.normal(k_x2, (n_states, B2), jnp.float32).astype(jnp.bfloat16)
    out2 = jax.block_until_ready(safeset_forward(x2_t, kp))
    assert out2.shape == (B2, 1)
    assert jnp.allclose(out2, reference_forward_f32(x2_t.astype(jnp.float32), raw),
                        atol=2e-2, rtol=2e-2), "mismatch vs f32 reference (tiled)"

    print("KERNEL_OK")
</pallas_src>

<mosaic_0001>
module attributes {stable_mosaic.version = 11 : i64} {
  func.func @safeset_kernel(%arg0: i32, %arg1: memref<4x128xbf16, #tpu.memory_space<vmem>>, %arg2: memref<32x4xbf16, #tpu.memory_space<vmem>>, %arg3: memref<32x1xf32, #tpu.memory_space<vmem>>, %arg4: memref<32x32xbf16, #tpu.memory_space<vmem>>, %arg5: memref<32x1xf32, #tpu.memory_space<vmem>>, %arg6: memref<32x32xbf16, #tpu.memory_space<vmem>>, %arg7: memref<32x1xf32, #tpu.memory_space<vmem>>, %arg8: memref<1x32xbf16, #tpu.memory_space<vmem>>, %arg9: memref<1x1xf32, #tpu.memory_space<vmem>>, %arg10: memref<1x128xf32, #tpu.memory_space<vmem>>) attributes {dimension_semantics = [#tpu.dimension_semantics<parallel>], iteration_bounds = array<i64: 1>, scalar_prefetch = 0 : i64, scratch_operands = 0 : i64, tpu.core_type = #tpu.core_type<tc>, window_params = [{transform_indices = @transform_0, window_bounds = array<i64: 4, 128>}, {pipeline_mode = #tpu.pipeline_mode<synchronous>, transform_indices = @transform_1, window_bounds = array<i64: 32, 4>}, {pipeline_mode = #tpu.pipeline_mode<synchronous>, transform_indices = @transform_2, window_bounds = array<i64: 32, 1>}, {pipeline_mode = #tpu.pipeline_mode<synchronous>, transform_indices = @transform_3, window_bounds = array<i64: 32, 32>}, {pipeline_mode = #tpu.pipeline_mode<synchronous>, transform_indices = @transform_4, window_bounds = array<i64: 32, 1>}, {pipeline_mode = #tpu.pipeline_mode<synchronous>, transform_indices = @transform_5, window_bounds = array<i64: 32, 32>}, {pipeline_mode = #tpu.pipeline_mode<synchronous>, transform_indices = @transform_6, window_bounds = array<i64: 32, 1>}, {pipeline_mode = #tpu.pipeline_mode<synchronous>, transform_indices = @transform_7, window_bounds = array<i64: 1, 32>}, {pipeline_mode = #tpu.pipeline_mode<synchronous>, transform_indices = @transform_8, window_bounds = array<i64: 1, 1>}, {transform_indices = @transform_9, window_bounds = array<i64: 1, 128>}]} {
    %c0 = arith.constant 0 : index
    %c0_0 = arith.constant 0 : index
    %0 = vector.load %arg1[%c0, %c0_0] : memref<4x128xbf16, #tpu.memory_space<vmem>>, vector<4x128xbf16>
    %c0_1 = arith.constant 0 : index
    %c0_2 = arith.constant 0 : index
    %1 = vector.load %arg2[%c0_1, %c0_2] : memref<32x4xbf16, #tpu.memory_space<vmem>>, vector<32x4xbf16>
    %cst = arith.constant dense<0.000000e+00> : vector<32x128xf32>
    %2 = tpu.matmul %1, %0, %cst {dimension_numbers = #tpu.dot_dimension_numbers<[1], [0], [0], [1], [0, 0, 1, 1], [], []>} : vector<32x4xbf16>, vector<4x128xbf16>, vector<32x128xf32> -> vector<32x128xf32>
    %c0_3 = arith.constant 0 : index
    %c0_4 = arith.constant 0 : index
    %3 = vector.load %arg3[%c0_3, %c0_4] : memref<32x1xf32, #tpu.memory_space<vmem>>, vector<32x1xf32>
    %4 = vector.broadcast %3 : vector<32x1xf32> to vector<32x128xf32>
    %5 = arith.addf %2, %4 : vector<32x128xf32>
    %cst_5 = arith.constant 2.000000e+01 : f32
    %6 = vector.broadcast %cst_5 : f32 to vector<32x128xf32>
    %7 = arith.minimumf %5, %6 : vector<32x128xf32>
    %cst_6 = arith.constant 2.000000e+01 : f32
    %8 = vector.broadcast %cst_6 : f32 to vector<32x128xf32>
    %9 = arith.cmpf ogt, %5, %8 : vector<32x128xf32>
    %10 = math.exp %7 : vector<32x128xf32>
    %11 = math.log1p %10 : vector<32x128xf32>
    %12 = arith.select %9, %5, %11 : vector<32x128xi1>, vector<32x128xf32>
    %c0_7 = arith.constant 0 : index
    %c0_8 = arith.constant 0 : index
    %13 = vector.load %arg4[%c0_7, %c0_8] : memref<32x32xbf16, #tpu.memory_space<vmem>>, vector<32x32xbf16>
    %14 = arith.truncf %12 : vector<32x128xf32> to vector<32x128xbf16>
    %cst_9 = arith.constant dense<0.000000e+00> : vector<32x128xf32>
    %15 = tpu.matmul %13, %14, %cst_9 {dimension_numbers = #tpu.dot_dimension_numbers<[1], [0], [0], [1], [0, 0, 1, 1], [], []>} : vector<32x32xbf16>, vector<32x128xbf16>, vector<32x128xf32> -> vector<32x128xf32>
    %c0_10 = arith.constant 0 : index
    %c0_11 = arith.constant 0 : index
    %16 = vector.load %arg5[%c0_10, %c0_11] : memref<32x1xf32, #tpu.memory_space<vmem>>, vector<32x1xf32>
    %17 = vector.broadcast %16 : vector<32x1xf32> to vector<32x128xf32>
    %18 = arith.addf %15, %17 : vector<32x128xf32>
    %cst_12 = arith.constant 2.000000e+01 : f32
    %19 = vector.broadcast %cst_12 : f32 to vector<32x128xf32>
    %20 = arith.minimumf %18, %19 : vector<32x128xf32>
    %cst_13 = arith.constant 2.000000e+01 : f32
    %21 = vector.broadcast %cst_13 : f32 to vector<32x128xf32>
    %22 = arith.cmpf ogt, %18, %21 : vector<32x128xf32>
    %23 = math.exp %20 : vector<32x128xf32>
    %24 = math.log1p %23 : vector<32x128xf32>
    %25 = arith.select %22, %18, %24 : vector<32x128xi1>, vector<32x128xf32>
    %c0_14 = arith.constant 0 : index
    %c0_15 = arith.constant 0 : index
    %26 = vector.load %arg6[%c0_14, %c0_15] : memref<32x32xbf16, #tpu.memory_space<vmem>>, vector<32x32xbf16>
    %27 = arith.truncf %25 : vector<32x128xf32> to vector<32x128xbf16>
    %cst_16 = arith.constant dense<0.000000e+00> : vector<32x128xf32>
    %28 = tpu.matmul %26, %27, %cst_16 {dimension_numbers = #tpu.dot_dimension_numbers<[1], [0], [0], [1], [0, 0, 1, 1], [], []>} : vector<32x32xbf16>, vector<32x128xbf16>, vector<32x128xf32> -> vector<32x128xf32>
    %c0_17 = arith.constant 0 : index
    %c0_18 = arith.constant 0 : index
    %29 = vector.load %arg7[%c0_17, %c0_18] : memref<32x1xf32, #tpu.memory_space<vmem>>, vector<32x1xf32>
    %30 = vector.broadcast %29 : vector<32x1xf32> to vector<32x128xf32>
    %31 = arith.addf %28, %30 : vector<32x128xf32>
    %cst_19 = arith.constant 2.000000e+01 : f32
    %32 = vector.broadcast %cst_19 : f32 to vector<32x128xf32>
    %33 = arith.minimumf %31, %32 : vector<32x128xf32>
    %cst_20 = arith.constant 2.000000e+01 : f32
    %34 = vector.broadcast %cst_20 : f32 to vector<32x128xf32>
    %35 = arith.cmpf ogt, %31, %34 : vector<32x128xf32>
    %36 = math.exp %33 : vector<32x128xf32>
    %37 = math.log1p %36 : vector<32x128xf32>
    %38 = arith.select %35, %31, %37 : vector<32x128xi1>, vector<32x128xf32>
    %c0_21 = arith.constant 0 : index
    %c0_22 = arith.constant 0 : index
    %39 = vector.load %arg8[%c0_21, %c0_22] : memref<1x32xbf16, #tpu.memory_space<vmem>>, vector<1x32xbf16>
    %40 = arith.truncf %38 : vector<32x128xf32> to vector<32x128xbf16>
    %cst_23 = arith.constant dense<0.000000e+00> : vector<1x128xf32>
    %41 = tpu.matmul %39, %40, %cst_23 {dimension_numbers = #tpu.dot_dimension_numbers<[1], [0], [0], [1], [0, 0, 1, 1], [], []>} : vector<1x32xbf16>, vector<32x128xbf16>, vector<1x128xf32> -> vector<1x128xf32>
    %c0_24 = arith.constant 0 : index
    %c0_25 = arith.constant 0 : index
    %42 = vector.load %arg9[%c0_24, %c0_25] : memref<1x1xf32, #tpu.memory_space<vmem>>, vector<1x1xf32>
    %43 = vector.broadcast %42 : vector<1x1xf32> to vector<1x128xf32>
    %44 = arith.addf %41, %43 : vector<1x128xf32>
    %cst_26 = arith.constant 0.000000e+00 : f32
    %45 = vector.broadcast %cst_26 : f32 to vector<1x128xf32>
    %46 = arith.subf %45, %44 : vector<1x128xf32>
    %47 = math.exp %46 : vector<1x128xf32>
    %cst_27 = arith.constant 1.000000e+00 : f32
    %48 = vector.broadcast %cst_27 : f32 to vector<1x128xf32>
    %49 = arith.addf %48, %47 : vector<1x128xf32>
    %cst_28 = arith.constant 1.000000e+00 : f32
    %50 = vector.broadcast %cst_28 : f32 to vector<1x128xf32>
    %51 = arith.divf %50, %49 : vector<1x128xf32>
    %c0_29 = arith.constant 0 : index
    %c0_30 = arith.constant 0 : index
    %52 = vector.load %arg10[%c0_29, %c0_30] : memref<1x128xf32, #tpu.memory_space<vmem>>, vector<1x128xf32>
    tpu.vector_store %arg10[%c0_29, %c0_30], %51 {strides = array<i32>} : memref<1x128xf32, #tpu.memory_space<vmem>>, vector<1x128xf32>,
    return
  }
  func.func @transform_0(%arg0: i32) -> (i32, i32) {
    %c0_i32 = arith.constant 0 : i32
    %c0_i32_0 = arith.constant 0 : i32
    return %c0_i32, %arg0 : i32, i32
  }
  func.func @transform_1(%arg0: i32) -> (i32, i32) {
    %c0_i32 = arith.constant 0 : i32
    %c0_i32_0 = arith.constant 0 : i32
    %c0_i32_1 = arith.constant 0 : i32
    return %c0_i32, %c0_i32_0 : i32, i32
  }
  func.func @transform_2(%arg0: i32) -> (i32, i32) {
    %c0_i32 = arith.constant 0 : i32
    %c0_i32_0 = arith.constant 0 : i32
    %c0_i32_1 = arith.constant 0 : i32
    return %c0_i32, %c0_i32_0 : i32, i32
  }
  func.func @transform_3(%arg0: i32) -> (i32, i32) {
    %c0_i32 = arith.constant 0 : i32
    %c0_i32_0 = arith.constant 0 : i32
    %c0_i32_1 = arith.constant 0 : i32
    return %c0_i32, %c0_i32_0 : i32, i32
  }
  func.func @transform_4(%arg0: i32) -> (i32, i32) {
    %c0_i32 = arith.constant 0 : i32
    %c0_i32_0 = arith.constant 0 : i32
    %c0_i32_1 = arith.constant 0 : i32
    return %c0_i32, %c0_i32_0 : i32, i32
  }
  func.func @transform_5(%arg0: i32) -> (i32, i32) {
    %c0_i32 = arith.constant 0 : i32
    %c0_i32_0 = arith.constant 0 : i32
    %c0_i32_1 = arith.constant 0 : i32
    return %c0_i32, %c0_i32_0 : i32, i32
  }
  func.func @transform_6(%arg0: i32) -> (i32, i32) {
    %c0_i32 = arith.constant 0 : i32
    %c0_i32_0 = arith.constant 0 : i32
    %c0_i32_1 = arith.constant 0 : i32
    return %c0_i32, %c0_i32_0 : i32, i32
  }
  func.func @transform_7(%arg0: i32) -> (i32, i32) {
    %c0_i32 = arith.constant 0 : i32
    %c0_i32_0 = arith.constant 0 : i32
    %c0_i32_1 = arith.constant 0 : i32
    return %c0_i32, %c0_i32_0 : i32, i32
  }
  func.func @transform_8(%arg0: i32) -> (i32, i32) {
    %c0_i32 = arith.constant 0 : i32
    %c0_i32_0 = arith.constant 0 : i32
    %c0_i32_1 = arith.constant 0 : i32
    return %c0_i32, %c0_i32_0 : i32, i32
  }
  func.func @transform_9(%arg0: i32) -> (i32, i32) {
    %c0_i32 = arith.constant 0 : i32
    %c0_i32_0 = arith.constant 0 : i32
    return %c0_i32, %arg0 : i32, i32
  }
}

</mosaic_0001>

<bundles_post_ra>
// kernel: _safeset_forward.1
= control target key start
LH: loop header
LB: loop body
LE: loop exit
PB: predicated region body
PF: predicated region fallthrough
CT: control target
= control target key end

     0   :  { %vm81_vm0 = vcmask 1041408   ;;  %v546_v0 = vmov 0   ;;  %vm74_vm1 = vcmask 31744   ;;  %vm200_vm10 = vcmask 261120   ;;  %s698_s2 = inlined_call_operand.vmem [shape: f32[32,1], index: 2, kind: input, shape index: {}]   ;;  %s699_s0 = inlined_call_operand.vmem [shape: bf16[4,128], index: 0, kind: input, shape index: {}]   ;;  %s700_s1 = inlined_call_operand.vmem [shape: bf16[32,4], index: 1, kind: input, shape index: {}]   ;;  %s701_s8 = inlined_call_operand.<no memory space> [shape: f32[1,1], index: 8, kind: input, shape index: {}]   ;;  %s702_s4 = inlined_call_operand.vmem [shape: f32[32,1], index: 4, kind: input, shape index: {}]   ;;  %s703_s6 = inlined_call_operand.vmem [shape: f32[32,1], index: 6, kind: input, shape index: {}]   ;;  %s704_s3 = inlined_call_operand.vmem [shape: bf16[32,32], index: 3, kind: input, shape index: {}]   ;;  %s705_s5 = inlined_call_operand.vmem [shape: bf16[32,32], index: 5, kind: input, shape index: {}]   ;;  %s706_s7 = inlined_call_operand.vmem [shape: bf16[1,32], index: 7, kind: input, shape index: {}]   ;;  %s707_s9 = inlined_call_operand.vmem [shape: f32[1,128], index: 9, kind: output, shape index: {}]  }
   0x1   :  { %491 = vset.pattern.permute.xlu0 %v546_v0  ;;  %v42_v1 = vld [vmem:[%s698_s2 + $0x10] sm:$0xff]  ;;  %v35_v2 = vld [vmem:[%s699_s0] sm:$0x3]  ;;  %492 = vset.pattern.permute.xlu1 %v546_v0  ;;  %v14_v3 = vstv %s701_s8  ;;  %v43_v7 = vld [vmem:[%s698_s2 + $0x18] sm:$0xff] }
   0x2   :  { %56 = vperm.xlu0 %491, %v42_v1   ;;  %v83_v4 = vsel %vm81_vm0, %v35_v2, 0  ;;  %v484_v5 = vld [vmem:[%s700_s1] sm:$0xff]  ;;  %15 = vst [vmem:[#allocation2] sm:$0x1] %v14_v3  ;;  %493 = vset.pattern.permute.xlu2 %v546_v0  ;;  %v41_v8 = vld [vmem:[%s698_s2 + $0x8] sm:$0xff]  ;;  %v291_v12 = vld [vmem:[%s703_s6 + $0x18] sm:$0xff] }
   0x3   :  { %v40_v6 = vld [vmem:[%s698_s2] sm:$0xff]  ;;  %92 = vmatpush.bf16.msra.mxu0 %v83_v4  ;;  %v167_v10 = vld [vmem:[%s702_s4 + $0x8] sm:$0xff]  ;;  %v168_v58 = vld [vmem:[%s702_s4 + $0x10] sm:$0xff] }
   0x4   :  { %46 = vperm.xlu1 %492, %v40_v6   ;;  %v166_v9 = vld [vmem:[%s702_s4] sm:$0xff]  ;;  %v485_v11 = vld [vmem:[%s700_s1 + $0x8] sm:$0xff]  ;;  %182 = vperm.xlu2 %493, %v168_v58  }
   0x5   :  { %v288_v13 = vld [vmem:[%s703_s6] sm:$0xff] }
   0x6   :  { %461 = vmatmul.msk.bf16.vlgmr.msra.gmra.mxu0 %vm74_vm1, %v484_v5 }
   0x9   :  { %v406_v14 = vld [vmem:[#allocation2] sm:$0x1] }
   0xa   :  { %61 = vperm.xlu0 %491, %v43_v7  }
   0xc   :  { %51 = vperm.xlu1 %492, %v41_v8  }
  0x12   :  { %172 = vperm.xlu0 %491, %v166_v9   ;;  %v169_v9 = vld [vmem:[%s702_s4 + $0x18] sm:$0xff] }
  0x13   :  { %187 = vperm.xlu2 %493, %v169_v9  }
  0x14   :  { %177 = vperm.xlu1 %492, %v167_v10  }
  0x16   :  { %462 = vmatmul.msk.bf16.gmra.mxu0 %vm74_vm1, %v485_v11 }
  0x1a   :  { %309 = vperm.xlu0 %491, %v291_v12  }
  0x1c   :  { %294 = vperm.xlu1 %492, %v288_v13  }
  0x22   :  { %409 = vperm.xlu0 %491, %v406_v14  }
  0x74   :  { %v57_v21 = vpop.permute.xlu0 %56 }
  0x76   :  { %v47_v15 = vpop.permute.xlu1 %46 }
  0x7c   :  { %v62_v30 = vpop.permute.xlu0 %61 }
  0x7e   :  { %v52_v18 = vpop.permute.xlu1 %51 }
  0x83   :  { %v94_v16 = vpop.f32.mrf.mxu0 }
  0x84   :  { %v635_v20 = vadd.f32 %v94_v16, %v47_v15  ;;  %v486_v15 = vld [vmem:[%s704_s3] sm:$0xff]  ;;  %v290_v16 = vld [vmem:[%s703_s6 + $0x10] sm:$0xff] }
  0x85   :  { %304 = vperm.xlu2 %493, %v290_v16  }
  0x86   :  { %v104_v23 = vmin.f32 %v635_v20, 20.0  ;;  %vm108_vm9 = vcmp.gt.f32.partialorder %v635_v20, 20.0 }
  0x88   :  { %v112_v28 = vmul.f32 1.442695, %v104_v23  ;;  %v173_v23 = vpop.permute.xlu0 %172 }
  0x8b   :  { %v96_v17 = vpop.f32.mrf.mxu0 }
  0x8c   :  { %v633_v19 = vadd.f32 %v96_v17, %v52_v18  ;;  %v289_v17 = vld [vmem:[%s703_s6 + $0x8] sm:$0xff] }
  0x8d   :  { %299 = vperm.xlu2 %493, %v289_v17   ;;  %v487_v18 = vld [vmem:[%s704_s3 + $0x8] sm:$0xff]  ;;  %v488_v17 = vld [vmem:[%s705_s5] sm:$0xff] }
  0x8e   :  { %v105_v22 = vmin.f32 %v633_v19, 20.0  ;;  %vm109_vm8 = vcmp.gt.f32.partialorder %v633_v19, 20.0 }
  0x90   :  { %v114_v26 = vmul.f32 1.442695, %v105_v22 }
  0x92   :  { %494 = vpow2.f32 %v114_v26 }
  0x93   :  { %v99_v24 = vpop.f32.mrf.mxu0 }
  0x94   :  { %v100_v25 = vadd.f32 %v99_v24, %v57_v21  ;;  %v178_v21 = vpop.permute.xlu1 %177 }
  0x96   :  { %v106_v27 = vmin.f32 %v100_v25, 20.0  ;;  %vm110_vm5 = vcmp.gt.f32.partialorder %v100_v25, 20.0 }
  0x98   :  { %v116_v29 = vmul.f32 1.442695, %v106_v27  ;;  %v495_v34 = vpop.eup %494 }
  0x99   :  { %v129_v39 = vadd.f32 1.0, %v495_v34  ;;  %v132_v45 = vmul.f32 -0.5, %v495_v34  ;;  %v135_v57 = vand.u32 2147483647, %v495_v34 }
  0x9a   :  { %496 = vpow2.f32 %v116_v29 }
  0x9b   :  { %498 = vpow2.f32 %v112_v28  ;;  %v101_v31 = vpop.f32.mrf.mxu0  ;;  %v133_v54 = vadd.f32 1.0, %v132_v45  ;;  %vm136_vm4 = vcmp.lt.f32.partialorder %v135_v57, 0.0004427343 }
  0x9c   :  { %v102_v32 = vadd.f32 %v101_v31, %v62_v30 }
  0x9d   :  { %v134_v3 = vmul.f32 %v495_v34, %v133_v54 }
  0x9e   :  { %v107_v33 = vmin.f32 %v102_v32, 20.0  ;;  %vm111_vm6 = vcmp.gt.f32.partialorder %v102_v32, 20.0 }
  0xa0   :  { %v497_v35 = vpop.eup %496  ;;  %v118_v36 = vmul.f32 1.442695, %v107_v33 }
  0xa1   :  { %v499_v37 = vpop.eup %498  ;;  %v138_v38 = vadd.f32 1.0, %v497_v35  ;;  %v141_v42 = vmul.f32 -0.5, %v497_v35  ;;  %v144_v50 = vand.u32 2147483647, %v497_v35 }
  0xa2   :  { %500 = vpow2.f32 %v118_v36  ;;  %v120_v40 = vadd.f32 1.0, %v499_v37  ;;  %v123_v47 = vmul.f32 -0.5, %v499_v37  ;;  %v126_v63 = vand.u32 2147483647, %v499_v37 }
  0xa3   :  { %502 = vlog2.f32 %v138_v38  ;;  %v142_v48 = vadd.f32 1.0, %v141_v42  ;;  %vm145_vm2 = vcmp.lt.f32.partialorder %v144_v50, 0.0004427343 }
  0xa4   :  { %504 = vlog2.f32 %v129_v39  ;;  %v124_v56 = vadd.f32 1.0, %v123_v47  ;;  %vm127_vm7 = vcmp.lt.f32.partialorder %v126_v63, 0.0004427343 }
  0xa5   :  { %506 = vlog2.f32 %v120_v40  ;;  %v143_v59 = vmul.f32 %v497_v35, %v142_v48 }
  0xa6   :  { %v125_v4 = vmul.f32 %v499_v37, %v124_v56 }
  0xa8   :  { %v501_v41 = vpop.eup %500 }
  0xa9   :  { %v147_v43 = vadd.f32 1.0, %v501_v41  ;;  %v150_v44 = vmul.f32 -0.5, %v501_v41  ;;  %v503_v46 = vpop.eup %502  ;;  %v153_v55 = vand.u32 2147483647, %v501_v41 }
  0xaa   :  { %v505_v49 = vpop.eup %504  ;;  %v140_v52 = vmul.f32 0.6931472, %v503_v46 }
  0xab   :  { %508 = vlog2.f32 %v147_v43  ;;  %v507_v51 = vpop.eup %506  ;;  %v151_v53 = vadd.f32 1.0, %v150_v44  ;;  %v131_v60 = vmul.f32 0.6931472, %v505_v49  ;;  %vm154_vm3 = vcmp.lt.f32.partialorder %v153_v55, 0.0004427343 }
  0xac   :  { %v122_v62 = vmul.f32 0.6931472, %v507_v51  ;;  %v146_v0 = vsel %vm145_vm2, %v143_v59, %v140_v52 }
  0xad   :  { %v152_v2 = vmul.f32 %v501_v41, %v151_v53  ;;  %v137_v6 = vsel %vm136_vm4, %v134_v3, %v131_v60  ;;  %v158_v7 = vsel %vm110_vm5, %v100_v25, %v146_v0  ;;  %v183_v25 = vpop.permute.xlu2 %182 }
  0xae   :  { %v128_v11 = vsel %vm127_vm7, %v125_v4, %v122_v62  ;;  %v157_v12 = vsel %vm109_vm8, %v633_v19, %v137_v6 }
  0xaf   :  { %v156_v13 = vsel %vm108_vm9, %v635_v20, %v128_v11 }
  0xb0   :  { %v164_v14 = vpack.c.bf16 %v157_v12, %v156_v13 }
  0xb1   :  { %v509_v61 = vpop.eup %508 }
  0xb2   :  { %v149_v1 = vmul.f32 0.6931472, %v509_v61 }
  0xb4   :  { %v155_v5 = vsel %vm154_vm3, %v152_v2, %v149_v1 }
  0xb5   :  { %v159_v8 = vsel %vm111_vm6, %v102_v32, %v155_v5  ;;  %v188_v34 = vpop.permute.xlu2 %187 }
  0xb6   :  { %v165_v10 = vpack.c.bf16 %v159_v8, %v158_v7 }
  0xb8   :  { %213 = vmatpush.bf16.msra.mxu1 %v165_v10 }
  0xbc   :  { %214 = vmatpush.bf16.msra.mxu1 %v164_v14 }
  0xbf   :  { %471 = vmatmul.msk.bf16.vlgmr.msra.gmra.mxu1 %vm200_vm10, %v486_v15 }
  0xcf   :  { %472 = vmatmul.msk.bf16.gmra.mxu1 %vm200_vm10, %v487_v18  ;;  %v489_v18 = vld [vmem:[%s705_s5 + $0x8] sm:$0xff] }
 0x13c   :  { %v216_v19 = vpop.f32.mrf.mxu1 }
 0x13d   :  { %v665_v24 = vadd.f32 %v216_v19, %v173_v23  ;;  %v305_v19 = vpop.permute.xlu2 %304 }
 0x13f   :  { %v226_v27 = vmin.f32 %v665_v24, 20.0  ;;  %vm230_vm2 = vcmp.gt.f32.partialorder %v665_v24, 20.0 }
 0x141   :  { %v234_v32 = vmul.f32 1.442695, %v226_v27 }
 0x144   :  { %v218_v20 = vpop.f32.mrf.mxu1 }
 0x145   :  { %v663_v22 = vadd.f32 %v218_v20, %v178_v21 }
 0x147   :  { %v227_v26 = vmin.f32 %v663_v22, 20.0  ;;  %vm231_vm1 = vcmp.gt.f32.partialorder %v663_v22, 20.0 }
 0x149   :  { %v236_v30 = vmul.f32 1.442695, %v227_v26 }
 0x14b   :  { %510 = vpow2.f32 %v236_v30 }
 0x14c   :  { %v221_v28 = vpop.f32.mrf.mxu1 }
 0x14d   :  { %v222_v29 = vadd.f32 %v221_v28, %v183_v25 }
 0x14f   :  { %v228_v31 = vmin.f32 %v222_v29, 20.0  ;;  %vm232_vm14 = vcmp.gt.f32.partialorder %v222_v29, 20.0 }
 0x151   :  { %v238_v33 = vmul.f32 1.442695, %v228_v31  ;;  %v511_v38 = vpop.eup %510 }
 0x152   :  { %v251_v43 = vadd.f32 1.0, %v511_v38  ;;  %v254_v49 = vmul.f32 -0.5, %v511_v38  ;;  %v257_v61 = vand.u32 2147483647, %v511_v38 }
 0x153   :  { %512 = vpow2.f32 %v238_v33 }
 0x154   :  { %514 = vpow2.f32 %v234_v32  ;;  %v223_v35 = vpop.f32.mrf.mxu1  ;;  %v255_v58 = vadd.f32 1.0, %v254_v49  ;;  %vm258_vm13 = vcmp.lt.f32.partialorder %v257_v61, 0.0004427343 }
 0x155   :  { %v224_v36 = vadd.f32 %v223_v35, %v188_v34  ;;  %v310_v34 = vpop.permute.xlu0 %309 }
 0x156   :  { %v256_v6 = vmul.f32 %v511_v38, %v255_v58 }
 0x157   :  { %v229_v37 = vmin.f32 %v224_v36, 20.0  ;;  %vm233_vm15 = vcmp.gt.f32.partialorder %v224_v36, 20.0 }
 0x159   :  { %v513_v39 = vpop.eup %512  ;;  %v240_v40 = vmul.f32 1.442695, %v229_v37 }
 0x15a   :  { %v515_v41 = vpop.eup %514  ;;  %v260_v42 = vadd.f32 1.0, %v513_v39  ;;  %v263_v46 = vmul.f32 -0.5, %v513_v39  ;;  %v266_v54 = vand.u32 2147483647, %v513_v39 }
 0x15b   :  { %516 = vpow2.f32 %v240_v40  ;;  %v242_v44 = vadd.f32 1.0, %v515_v41  ;;  %v245_v51 = vmul.f32 -0.5, %v515_v41  ;;  %v248_v2 = vand.u32 2147483647, %v515_v41 }
 0x15c   :  { %518 = vlog2.f32 %v260_v42  ;;  %v264_v52 = vadd.f32 1.0, %v263_v46  ;;  %vm267_vm11 = vcmp.lt.f32.partialorder %v266_v54, 0.0004427343 }
 0x15d   :  { %520 = vlog2.f32 %v251_v43  ;;  %v246_v60 = vadd.f32 1.0, %v245_v51  ;;  %vm249_vm0 = vcmp.lt.f32.partialorder %v248_v2, 0.0004427343 }
 0x15e   :  { %522 = vlog2.f32 %v242_v44  ;;  %v265_v62 = vmul.f32 %v513_v39, %v264_v52 }
 0x15f   :  { %v247_v7 = vmul.f32 %v515_v41, %v246_v60 }
 0x161   :  { %v517_v45 = vpop.eup %516 }
 0x162   :  { %v269_v47 = vadd.f32 1.0, %v517_v45  ;;  %v272_v48 = vmul.f32 -0.5, %v517_v45  ;;  %v519_v50 = vpop.eup %518  ;;  %v275_v59 = vand.u32 2147483647, %v517_v45 }
 0x163   :  { %v521_v53 = vpop.eup %520  ;;  %v262_v56 = vmul.f32 0.6931472, %v519_v50 }
 0x164   :  { %524 = vlog2.f32 %v269_v47  ;;  %v523_v55 = vpop.eup %522  ;;  %v273_v57 = vadd.f32 1.0, %v272_v48  ;;  %v253_v63 = vmul.f32 0.6931472, %v521_v53  ;;  %vm276_vm12 = vcmp.lt.f32.partialorder %v275_v59, 0.0004427343 }
 0x165   :  { %v244_v1 = vmul.f32 0.6931472, %v523_v55  ;;  %v268_v3 = vsel %vm267_vm11, %v265_v62, %v262_v56 }
 0x166   :  { %v274_v5 = vmul.f32 %v517_v45, %v273_v57  ;;  %v259_v9 = vsel %vm258_vm13, %v256_v6, %v253_v63  ;;  %v280_v10 = vsel %vm232_vm14, %v222_v29, %v268_v3 }
 0x167   :  { %v250_v13 = vsel %vm249_vm0, %v247_v7, %v244_v1  ;;  %v279_v14 = vsel %vm231_vm1, %v663_v22, %v259_v9  ;;  %v300_v22 = vpop.permute.xlu2 %299 }
 0x168   :  { %v278_v15 = vsel %vm230_vm2, %v665_v24, %v250_v13  ;;  %v295_v24 = vpop.permute.xlu1 %294 }
 0x169   :  { %v286_v16 = vpack.c.bf16 %v279_v14, %v278_v15 }
 0x16a   :  { %v525_v0 = vpop.eup %524 }
 0x16b   :  { %v271_v4 = vmul.f32 0.6931472, %v525_v0 }
 0x16d   :  { %v277_v8 = vsel %vm276_vm12, %v274_v5, %v271_v4 }
 0x16e   :  { %v281_v11 = vsel %vm233_vm15, %v224_v36, %v277_v8 }
 0x16f   :  { %v287_v12 = vpack.c.bf16 %v281_v11, %v280_v10 }
 0x171   :  { %334 = vmatpush.bf16.msra.mxu2 %v287_v12 }
 0x175   :  { %335 = vmatpush.bf16.msra.mxu2 %v286_v16 }
 0x178   :  { %481 = vmatmul.msk.bf16.vlgmr.msra.gmra.mxu2 %vm200_vm10, %v488_v17  ;;  %v403_v17 = vld [vmem:[%s706_s7] sm:$0x1] }
 0x188   :  { %482 = vmatmul.msk.bf16.gmra.mxu2 %vm200_vm10, %v489_v18  ;;  %v410_v18 = vpop.permute.xlu0 %409 }
 0x1fb   :  { %v337_v20 = vpop.f32.mrf.mxu2 }
 0x1fc   :  { %v683_v25 = vadd.f32 %v337_v20, %v295_v24 }
 0x1fe   :  { %v347_v27 = vmin.f32 %v683_v25, 20.0  ;;  %vm351_vm11 = vcmp.gt.f32.partialorder %v683_v25, 20.0 }
 0x200   :  { %v355_v32 = vmul.f32 1.442695, %v347_v27 }
 0x203   :  { %v339_v21 = vpop.f32.mrf.mxu2 }
 0x204   :  { %v681_v23 = vadd.f32 %v339_v21, %v300_v22 }
 0x206   :  { %v348_v26 = vmin.f32 %v681_v23, 20.0  ;;  %vm352_vm9 = vcmp.gt.f32.partialorder %v681_v23, 20.0 }
 0x208   :  { %v357_v30 = vmul.f32 1.442695, %v348_v26 }
 0x20a   :  { %526 = vpow2.f32 %v357_v30 }
 0x20b   :  { %v342_v28 = vpop.f32.mrf.mxu2 }
 0x20c   :  { %v343_v29 = vadd.f32 %v342_v28, %v305_v19  ;;  %v412_v19 = vperm.slane %v410_v18, 0 }
 0x20e   :  { %v349_v31 = vmin.f32 %v343_v29, 20.0  ;;  %vm353_vm6 = vcmp.gt.f32.partialorder %v343_v29, 20.0 }
 0x210   :  { %v359_v33 = vmul.f32 1.442695, %v349_v31  ;;  %v527_v38 = vpop.eup %526 }
 0x211   :  { %v372_v43 = vadd.f32 1.0, %v527_v38  ;;  %v375_v49 = vmul.f32 -0.5, %v527_v38  ;;  %v378_v61 = vand.u32 2147483647, %v527_v38 }
 0x212   :  { %528 = vpow2.f32 %v359_v33 }
 0x213   :  { %530 = vpow2.f32 %v355_v32  ;;  %v344_v35 = vpop.f32.mrf.mxu2  ;;  %v376_v58 = vadd.f32 1.0, %v375_v49  ;;  %vm379_vm5 = vcmp.lt.f32.partialorder %v378_v61, 0.0004427343 }
 0x214   :  { %v345_v36 = vadd.f32 %v344_v35, %v310_v34 }
 0x215   :  { %v377_v6 = vmul.f32 %v527_v38, %v376_v58 }
 0x216   :  { %v350_v37 = vmin.f32 %v345_v36, 20.0  ;;  %vm354_vm7 = vcmp.gt.f32.partialorder %v345_v36, 20.0 }
 0x218   :  { %v529_v39 = vpop.eup %528  ;;  %v361_v40 = vmul.f32 1.442695, %v350_v37 }
 0x219   :  { %v531_v41 = vpop.eup %530  ;;  %v381_v42 = vadd.f32 1.0, %v529_v39  ;;  %v384_v46 = vmul.f32 -0.5, %v529_v39  ;;  %v387_v54 = vand.u32 2147483647, %v529_v39 }
 0x21a   :  { %532 = vpow2.f32 %v361_v40  ;;  %v363_v44 = vadd.f32 1.0, %v531_v41  ;;  %v366_v51 = vmul.f32 -0.5, %v531_v41  ;;  %v369_v2 = vand.u32 2147483647, %v531_v41 }
 0x21b   :  { %534 = vlog2.f32 %v381_v42  ;;  %v385_v52 = vadd.f32 1.0, %v384_v46  ;;  %vm388_vm3 = vcmp.lt.f32.partialorder %v387_v54, 0.0004427343 }
 0x21c   :  { %536 = vlog2.f32 %v372_v43  ;;  %v367_v60 = vadd.f32 1.0, %v366_v51  ;;  %vm370_vm8 = vcmp.lt.f32.partialorder %v369_v2, 0.0004427343 }
 0x21d   :  { %538 = vlog2.f32 %v363_v44  ;;  %v386_v62 = vmul.f32 %v529_v39, %v385_v52 }
 0x21e   :  { %v368_v7 = vmul.f32 %v531_v41, %v367_v60 }
 0x220   :  { %v533_v45 = vpop.eup %532 }
 0x221   :  { %v390_v47 = vadd.f32 1.0, %v533_v45  ;;  %v393_v48 = vmul.f32 -0.5, %v533_v45  ;;  %v535_v50 = vpop.eup %534  ;;  %v396_v59 = vand.u32 2147483647, %v533_v45 }
 0x222   :  { %v537_v53 = vpop.eup %536  ;;  %v383_v56 = vmul.f32 0.6931472, %v535_v50 }
 0x223   :  { %540 = vlog2.f32 %v390_v47  ;;  %v539_v55 = vpop.eup %538  ;;  %v394_v57 = vadd.f32 1.0, %v393_v48  ;;  %v374_v63 = vmul.f32 0.6931472, %v537_v53  ;;  %vm397_vm4 = vcmp.lt.f32.partialorder %v396_v59, 0.0004427343 }
 0x224   :  { %v365_v1 = vmul.f32 0.6931472, %v539_v55  ;;  %v389_v3 = vsel %vm388_vm3, %v386_v62, %v383_v56 }
 0x225   :  { %v395_v5 = vmul.f32 %v533_v45, %v394_v57  ;;  %v380_v9 = vsel %vm379_vm5, %v377_v6, %v374_v63  ;;  %v401_v10 = vsel %vm353_vm6, %v343_v29, %v389_v3 }
 0x226   :  { %v371_v13 = vsel %vm370_vm8, %v368_v7, %v365_v1  ;;  %v400_v14 = vsel %vm352_vm9, %v681_v23, %v380_v9 }
 0x227   :  { %v399_v15 = vsel %vm351_vm11, %v683_v25, %v371_v13 }
 0x228   :  { %v404_v16 = vpack.c.bf16 %v400_v14, %v399_v15 }
 0x229   :  { %v541_v0 = vpop.eup %540 }
 0x22a   :  { %v392_v4 = vmul.f32 0.6931472, %v541_v0 }
 0x22c   :  { %v398_v8 = vsel %vm397_vm4, %v395_v5, %v392_v4 }
 0x22d   :  { %v402_v11 = vsel %vm354_vm7, %v345_v36, %v398_v8 }
 0x22e   :  { %v405_v12 = vpack.c.bf16 %v402_v11, %v401_v10 }
 0x230   :  { %422 = vmatpush.bf16.msra.mxu3 %v405_v12 }
 0x234   :  { %423 = vmatpush.bf16.msra.mxu3 %v404_v16 }
 0x237   :  { %483 = vmatmul.msk.bf16.vlgmr.msra.gmra.mxu3 %vm200_vm10, %v403_v17 }
 0x2ba   :  { %v425_v20 = vpop.f32.mrf.mxu3 }
 0x2bb   :  { %v426_v21 = vadd.f32 %v425_v20, %v412_v19 }
 0x2bd   :  { %v429_v22 = vsub.f32 0.0, %v426_v21 }
 0x2bf   :  { %v430_v24 = vmul.f32 1.442695, %v429_v22 }
 0x2c1   :  { %542 = vpow2.f32 %v430_v24 }
 0x2c2   :  { %v427_v23 = vpop.f32.mrf.mxu3 }
 0x2c7   :  { %v543_v26 = vpop.eup %542 }
 0x2c8   :  { %v432_v27 = vadd.f32 1.0, %v543_v26 }
 0x2ca   :  { %544 = vrcp.f32 %v432_v27  ;;  %v444_v30 = vand.u32 2147483648, %v432_v27  ;;  %v442_v32 = vand.u32 2147483647, %v432_v27  ;;  %vm438_vm10 = vweird.f32 %v432_v27 }
 0x2cc   :  { %v445_v34 = vor.u32 1.1754944e-38, %v444_v30  ;;  %vm443_vm14 = vcmp.eq.f32.partialorder %v442_v32, 8.507059e+37 }
 0x2d0   :  { %v545_v25 = vpop.eup %544 }
 0x2d1   :  { %v434_v28 = vmul.f32 %v545_v25, %v432_v27  ;;  %vm439_vm12 = vweird.f32 %v545_v25 }
 0x2d2   :  { %vm440_vm13 = vmor %vm438_vm10, %vm439_vm12 }
 0x2d3   :  { %v435_v29 = vsub.f32 1.0, %v434_v28 }
 0x2d5   :  { %v436_v31 = vmul.f32 %v545_v25, %v435_v29 }
 0x2d7   :  { %v437_v33 = vadd.f32 %v545_v25, %v436_v31 }
 0x2d9   :  { %v441_v35 = vsel %vm440_vm13, %v545_v25, %v437_v33 }
 0x2da   :  { %v446_v36 = vsel %vm443_vm14, %v445_v34, %v441_v35 }
 0x2db   :  { %448 = vst [vmem:[%s707_s9] sm:$0x1] %v446_v36 }

</bundles_post_ra>
